<compile_context>
chip_gen: v5e
topology: v5e:2x2
jax: 0.10.0
libtpu: 0.0.40
codegen_flags: <defaults>
</compile_context>

<pallas_src>
import jax
import jax.numpy as jnp
from jax.experimental import pallas as pl
from jax.experimental.pallas import tpu as pltpu

LANE = 128


# --------------------------------------------------------------------------- #
# Small helpers
# --------------------------------------------------------------------------- #

def _round_up(x, m):
    return ((x + m - 1) // m) * m


def _pick_tile(n, target):
    """Largest multiple-of-128 tile <= target that divides n (n is a multiple of 128)."""
    t = max(LANE, (min(target, n) // LANE) * LANE)
    while n % t:
        t -= LANE
    return max(t, LANE)


def _pad2(a, rows, cols):
    return jnp.zeros((rows, cols), a.dtype).at[: a.shape[0], : a.shape[1]].set(a)


def _vmem_budget_bytes():
    """Per-generation scoped-VMEM budget with headroom (critical on v7x: 64 MiB physical)."""
    cap = 64 * 1024 * 1024
    try:
        info = pltpu.get_tpu_info()
        cap = int(getattr(info, "vmem_capacity_bytes", cap))
    except Exception:
        pass
    return max(32 * 1024 * 1024, min(cap - 16 * 1024 * 1024, 100 * 1024 * 1024))


def _resident_h_ok(n_pad, fout, row_tile, k_tile, budget):
    """Can H (n_pad, fout) bf16 stay resident in VMEM (conservatively double-buffered)?"""
    a_buf = 2 * row_tile * k_tile              # int8 A tile, double-buffered
    h_res = 2 * n_pad * fout * 2               # resident bf16 H (assume 2 buffers)
    acc = row_tile * fout * 4                  # fp32 accumulator
    outs = 2 * row_tile * fout * 2             # bf16 output tile, double-buffered
    misc = 8 * 1024 * 1024                     # params, pool scratch, compiler internal
    return a_buf + h_res + acc + outs + misc <= budget


# --------------------------------------------------------------------------- #
# Pallas kernels
# --------------------------------------------------------------------------- #

def xw_kernel(x_ref, w_ref, d_ref, o_ref):
    # H0' = D^-1/2 * (X @ W0)  — row-tiled; only used for the very first feature transform.
    h = jnp.dot(x_ref[...], w_ref[...], preferred_element_type=jnp.float32)
    o_ref[...] = (h * d_ref[...]).astype(o_ref.dtype)


def make_conv_fused_kernel(k_tile, resident_h):
    """Non-final conv layer: acc += A_q @ H'; epilogue fuses BN+ReLU and the NEXT layer's X@W."""
    def kernel(a_ref, h_ref, d_ref, scale_ref, shift_ref, w_next_ref, o_ref, acc_ref):
        k = pl.program_id(1)

        @pl.when(k == 0)
        def _():
            acc_ref[...] = jnp.zeros_like(acc_ref)

        if resident_h:
            start = pl.multiple_of(k * k_tile, k_tile)
            h_blk = h_ref[pl.ds(start, k_tile), :]
        else:
            h_blk = h_ref[...]
        # int8 -> bf16 dequant at the MXU input (bandwidth is the bound, not MXU dtype).
        a_blk = a_ref[...].astype(jnp.float32).astype(jnp.bfloat16)
        acc_ref[...] += jnp.dot(a_blk, h_blk, preferred_element_type=jnp.float32)

        @pl.when(k == pl.num_programs(1) - 1)
        def _():
            # scale_ref already includes the int8 scale s_A; shift_ref includes the conv bias.
            y = (acc_ref[...] * d_ref[...]) * scale_ref[...] + shift_ref[...]
            y = jnp.maximum(y, 0.0)
            h_next = (y * d_ref[...]).astype(jnp.bfloat16)      # pre-scale for the next layer
            o_ref[...] = jnp.dot(h_next, w_next_ref[...],
                                 preferred_element_type=jnp.float32).astype(o_ref.dtype)
    return kernel


def make_last_kernel(k_tile, resident_h, n_head):
    """Final conv layer + global_mean_pool + reversed linear head, all in one pallas_call."""
    def kernel(*refs):
        a_ref, h_ref, d_ref, scale_ref, shift_ref, p_ref = refs[:6]
        head = refs[6:6 + 2 * n_head]
        o_ref, acc_ref, pool_ref = refs[6 + 2 * n_head:]
        i = pl.program_id(0)
        k = pl.program_id(1)

        @pl.when(k == 0)
        def _():
            acc_ref[...] = jnp.zeros_like(acc_ref)

        @pl.when((i == 0) & (k == 0))
        def _():
            pool_ref[...] = jnp.zeros_like(pool_ref)

        if resident_h:
            start = pl.multiple_of(k * k_tile, k_tile)
            h_blk = h_ref[pl.ds(start, k_tile), :]
        else:
            h_blk = h_ref[...]
        a_blk = a_ref[...].astype(jnp.float32).astype(jnp.bfloat16)
        acc_ref[...] += jnp.dot(a_blk, h_blk, preferred_element_type=jnp.float32)

        @pl.when(k == pl.num_programs(1) - 1)
        def _():
            y = (acc_ref[...] * d_ref[...]) * scale_ref[...] + shift_ref[...]
            y = jnp.maximum(y, 0.0)
            # global_mean_pool partial sum for this row tile (padded nodes have zero P weight).
            pool_ref[...] += jnp.dot(p_ref[...], y, preferred_element_type=jnp.float32)

        @pl.when((i == pl.num_programs(0) - 1) & (k == pl.num_programs(1) - 1))
        def _():
            h = pool_ref[...]
            for li in range(n_head):                      # reversed linear stack, f32
                w_ref, b_ref = head[2 * li], head[2 * li + 1]
                h = jnp.dot(h, w_ref[...], preferred_element_type=jnp.float32) + b_ref[...]
                h = jnp.maximum(h, 0.0)                   # see TODO(synk) at top
            o_ref[...] = h.astype(o_ref.dtype)
    return kernel


# --------------------------------------------------------------------------- #
# pallas_call wrappers
# --------------------------------------------------------------------------- #

def feature_transform(x, w, d, *, row_tile, budget):
    n, fin = x.shape
    fout = w.shape[1]
    return pl.pallas_call(
        xw_kernel,
        grid=(n // row_tile,),
        in_specs=[pl.BlockSpec((row_tile, fin), lambda i: (i, 0)),
                  pl.BlockSpec((fin, fout), lambda i: (0, 0)),
                  pl.BlockSpec((row_tile, 1), lambda i: (i, 0))],
        out_specs=pl.BlockSpec((row_tile, fout), lambda i: (i, 0)),
        out_shape=jax.ShapeDtypeStruct((n, fout), jnp.bfloat16),
        compiler_params=pltpu.CompilerParams(
            dimension_semantics=("parallel",), vmem_limit_bytes=budget),
    )(x, w, d)


def conv_fused_layer(a_q, h, d, scale_sa, shift, w_next, *, row_tile, k_tile, budget):
    n = a_q.shape[0]
    fout = h.shape[1]
    fnext = w_next.shape[1]
    resident = _resident_h_ok(n, fout, row_tile, k_tile, budget)
    h_spec = (pl.BlockSpec((n, fout), lambda i, k: (0, 0)) if resident
              else pl.BlockSpec((k_tile, fout), lambda i, k: (k, 0)))
    # NOTE: pl.Buffered(3) on the A spec would further hide DMA issue latency if a trace
    # shows exposed DMA at k-step boundaries; left at default depth here.
    return pl.pallas_call(
        make_conv_fused_kernel(k_tile, resident),
        grid=(n // row_tile, n // k_tile),
        in_specs=[pl.BlockSpec((row_tile, k_tile), lambda i, k: (i, k)),
                  h_spec,
                  pl.BlockSpec((row_tile, 1), lambda i, k: (i, 0)),
                  pl.BlockSpec((1, fout), lambda i, k: (0, 0)),
                  pl.BlockSpec((1, fout), lambda i, k: (0, 0)),
                  pl.BlockSpec((fout, fnext), lambda i, k: (0, 0))],
        out_specs=pl.BlockSpec((row_tile, fnext), lambda i, k: (i, 0)),
        out_shape=jax.ShapeDtypeStruct((n, fnext), jnp.bfloat16),
        scratch_shapes=[pltpu.VMEM((row_tile, fout), jnp.float32)],
        compiler_params=pltpu.CompilerParams(
            dimension_semantics=("parallel", "arbitrary"),
            vmem_limit_bytes=budget),
    )(a_q, h, d, scale_sa, shift, w_next)


def last_conv_pool_head(a_q, h, d, scale_sa, shift, pool_mat, heads, out_dim_pad,
                        *, row_tile, k_tile, budget):
    n = a_q.shape[0]
    fout = h.shape[1]
    g_pad = pool_mat.shape[0]
    n_head = len(heads)
    resident = _resident_h_ok(n, fout, row_tile, k_tile, budget)
    h_spec = (pl.BlockSpec((n, fout), lambda i, k: (0, 0)) if resident
              else pl.BlockSpec((k_tile, fout), lambda i, k: (k, 0)))
    in_specs = [pl.BlockSpec((row_tile, k_tile), lambda i, k: (i, k)),
                h_spec,
                pl.BlockSpec((row_tile, 1), lambda i, k: (i, 0)),
                pl.BlockSpec((1, fout), lambda i, k: (0, 0)),
                pl.BlockSpec((1, fout), lambda i, k: (0, 0)),
                pl.BlockSpec((g_pad, row_tile), lambda i, k: (0, i))]
    args = [a_q, h, d, scale_sa, shift, pool_mat]
    for (w, b) in heads:
        in_specs.append(pl.BlockSpec(w.shape, lambda i, k: (0, 0)))
        in_specs.append(pl.BlockSpec(b.shape, lambda i, k: (0, 0)))
        args += [w, b]
    return pl.pallas_call(
        make_last_kernel(k_tile, resident, n_head),
        grid=(n // row_tile, n // k_tile),
        in_specs=in_specs,
        out_specs=pl.BlockSpec((g_pad, out_dim_pad), lambda i, k: (0, 0)),
        out_shape=jax.ShapeDtypeStruct((g_pad, out_dim_pad), jnp.float32),
        scratch_shapes=[pltpu.VMEM((row_tile, fout), jnp.float32),
                        pltpu.VMEM((g_pad, fout), jnp.float32)],
        compiler_params=pltpu.CompilerParams(
            # pooled accumulator persists across row tiles -> row axis must stay sequential
            dimension_semantics=("arbitrary", "arbitrary"),
            vmem_limit_bytes=budget),
    )(*args)


# --------------------------------------------------------------------------- #
# Glue: graph preprocessing + parameters (host-side, tiny)
# --------------------------------------------------------------------------- #

def build_norm_adj(n_nodes, edge_index, edge_weight):
    """A_hat = D^-1/2 (A_w + I) D^-1/2 (matches gcn_norm for symmetric edge lists)."""
    a = jnp.zeros((n_nodes, n_nodes), jnp.float32)
    a = a.at[edge_index[1], edge_index[0]].add(edge_weight.astype(jnp.float32))
    a = a + jnp.eye(n_nodes, dtype=jnp.float32)
    d_inv_sqrt = jax.lax.rsqrt(a.sum(axis=1))
    return a * d_inv_sqrt[:, None] * d_inv_sqrt[None, :]


def quantize_adj(n_nodes, edge_index, edge_weight, n_pad):
    """int8 (A_w + I) with one scale s_A; returns (A_q padded, D^-1/2 padded, s_A)."""
    a = jnp.zeros((n_nodes, n_nodes), jnp.float32)
    a = a.at[edge_index[1], edge_index[0]].add(edge_weight.astype(jnp.float32))
    a = a + jnp.eye(n_nodes, dtype=jnp.float32)
    d_inv_sqrt = jax.lax.rsqrt(jnp.maximum(a.sum(axis=1), 1e-12))
    s_a = jnp.max(jnp.abs(a)) / 127.0
    a_q = jnp.clip(jnp.round(a / s_a), -127, 127).astype(jnp.int8)
    a_q_pad = _pad2(a_q, n_pad, n_pad)
    d_pad = _pad2(d_inv_sqrt[:, None], n_pad, 1)          # padded nodes -> 0 (masks them)
    # TODO(synk): re-validate the single-scale int8 quantization on high-degree graphs where
    #             normalized edge weights get very small.
    return a_q_pad, d_pad, s_a


def build_pool_matrix(batch, num_graphs):
    onehot = (batch[None, :] == jnp.arange(num_graphs, dtype=batch.dtype)[:, None])
    onehot = onehot.astype(jnp.float32)
    counts = onehot.sum(axis=1, keepdims=True)
    return onehot / jnp.maximum(counts, 1.0)


def init_params(key, input_dim, output_dim, nconv, mult=2, eps=1e-5):
    raw = {"convs": [], "linears": []}
    key, kw, kb = jax.random.split(key, 3)
    raw["linears"].append((
        jax.random.normal(kw, (input_dim, output_dim), jnp.float32) * 0.1,
        jax.random.normal(kb, (1, output_dim), jnp.float32) * 0.1,
    ))
    d = input_dim
    for _ in range(nconv):
        d_out = d * mult
        key, kw, kb, kg, kbeta = jax.random.split(key, 5)
        w = jax.random.normal(kw, (d, d_out), jnp.float32) * 0.1
        b = jax.random.normal(kb, (1, d_out), jnp.float32) * 0.1
        # eval-mode BatchNorm1d: running_mean=0, running_var=1
        gamma = 1.0 + 0.1 * jax.random.normal(kg, (1, d_out), jnp.float32)
        beta = 0.1 * jax.random.normal(kbeta, (1, d_out), jnp.float32)
        scale = gamma / jnp.sqrt(1.0 + eps)
        shift = beta
        raw["convs"].append((w, b, scale, shift))
        key, klw, klb = jax.random.split(key, 3)
        raw["linears"].append((
            jax.random.normal(klw, (d_out, d), jnp.float32) * 0.1,
            jax.random.normal(klb, (1, d), jnp.float32) * 0.1,
        ))
        d = d_out
    return raw


def pad_params(raw):
    convs = []
    for (w, b, scale, shift) in raw["convs"]:
        fin, fout = w.shape
        fin_p, fout_p = _round_up(fin, LANE), _round_up(fout, LANE)
        convs.append((
            _pad2(w, fin_p, fout_p).astype(jnp.bfloat16),
            _pad2(scale, 1, fout_p),                       # BN scale (s_A folded in later)
            _pad2(b * scale + shift, 1, fout_p),           # conv bias folded into BN affine
        ))
    linears = []
    for (w, b) in raw["linears"][::-1]:                    # applied in reverse, as in PyTorch
        fin, fout = w.shape
        fin_p, fout_p = _round_up(fin, LANE), _round_up(fout, LANE)
        linears.append((_pad2(w, fin_p, fout_p),           # head kept in f32 (tiny)
                        _pad2(b, 1, fout_p)))
    return {"convs": convs, "linears": linears}


def gcn_class_forward(padded, x_pad, a_q_pad, d_pad, s_a, pool_pad, out_dim_pad):
    budget = _vmem_budget_bytes()
    n_pad = a_q_pad.shape[0]
    # Decoupled tiles: big k_tile (amortize per-step overhead), row_tile targets 512 and is
    # split so there are >=2 row tiles when possible (v7x megacore sharding).
    row_tile = _pick_tile(n_pad, 512)
    if n_pad // row_tile < 2 and n_pad >= 2 * LANE:
        row_tile = _pick_tile(n_pad, max(LANE, (n_pad // (2 * LANE)) * LANE))
    k_tile = _pick_tile(n_pad, 2048)

    convs = padded["convs"]
    heads = padded["linears"]
    nconv = len(convs)
    assert nconv >= 1

    # H0' = D^-1/2 (X @ W0) — the only standalone feature-transform pass.
    h = feature_transform(x_pad, convs[0][0], d_pad, row_tile=row_tile, budget=budget)

    # Non-final conv layers: agg + BN + ReLU + next X@W fused in one call each.
    for l in range(nconv - 1):
        _, scale, shift = convs[l]
        w_next = convs[l + 1][0]
        h = conv_fused_layer(a_q_pad, h, d_pad, scale * s_a, shift, w_next,
                             row_tile=row_tile, k_tile=k_tile, budget=budget)
        # dropout: identity (see TODO(synk) at top)

    # Final conv layer + global_mean_pool + reversed linear head in one call.
    _, scale, shift = convs[-1]
    return last_conv_pool_head(a_q_pad, h, d_pad, scale * s_a, shift, pool_pad, heads,
                               out_dim_pad, row_tile=row_tile, k_tile=k_tile, budget=budget)


def reference_forward(raw, x, a_hat, pool_mat):
    for (w, b, scale, shift) in raw["convs"]:
        x = jnp.maximum((a_hat @ (x @ w) + b) * scale + shift, 0.0)
    x = pool_mat @ x
    for (w, b) in raw["linears"][::-1]:
        x = jnp.maximum(x @ w + b, 0.0)
    return x


# --------------------------------------------------------------------------- #
# Main
# --------------------------------------------------------------------------- #

if __name__ == "__main__":
    key = jax.random.PRNGKey(0)

    input_dim = 8
    output_dim = 4
    nconv = 2
    mult = 2
    num_graphs = 2
    nodes_per_graph = 8
    n_nodes = num_graphs * nodes_per_graph

    # deterministic small graph batch: a bidirectional ring per graph
    src, dst = [], []
    for g in range(num_graphs):
        base = g * nodes_per_graph
        for k in range(nodes_per_graph):
            a_, b_ = base + k, base + (k + 1) % nodes_per_graph
            src += [a_, b_]
            dst += [b_, a_]
    edge_index = jnp.array([src, dst], dtype=jnp.int32)
    batch = jnp.repeat(jnp.arange(num_graphs, dtype=jnp.int32), nodes_per_graph)

    key, kx, kw = jax.random.split(key, 3)
    x = jax.random.normal(kx, (n_nodes, input_dim), jnp.float32)
    edge_weight = jax.random.uniform(kw, (edge_index.shape[1],), jnp.float32,
                                     minval=0.5, maxval=1.5)

    # Pad nodes/graphs/features: padded rows never reach real outputs (zero adjacency columns,
    # zero D^-1/2 entries and zero pool weights for padded nodes).
    n_pad = _round_up(n_nodes, LANE) if n_nodes <= 512 else _round_up(n_nodes, 512)
    g_pad = _round_up(num_graphs, 8)
    fin_pad = _round_up(input_dim, LANE)
    out_pad = _round_up(output_dim, LANE)

    a_hat = build_norm_adj(n_nodes, edge_index, edge_weight)          # fp32 reference adjacency
    a_q_pad, d_pad, s_a = quantize_adj(n_nodes, edge_index, edge_weight, n_pad)
    pool_mat = build_pool_matrix(batch, num_graphs)
    pool_pad = _pad2(pool_mat, g_pad, n_pad)                          # f32 pooling weights
    x_pad = _pad2(x, n_pad, fin_pad).astype(jnp.bfloat16)

    raw_params = init_params(jax.random.PRNGKey(0), input_dim, output_dim, nconv, mult)
    padded_params = pad_params(raw_params)

    out_full = gcn_class_forward(padded_params, x_pad, a_q_pad, d_pad, s_a, pool_pad, out_pad)
    out_full = jax.block_until_ready(out_full)
    out = out_full[:num_graphs, :output_dim]

    ref = reference_forward(raw_params, x, a_hat, pool_mat)

    assert out.shape == (num_graphs, output_dim), out.shape
    assert bool(jnp.all(jnp.isfinite(out)))
    assert bool(jnp.allclose(out, ref, rtol=1e-1, atol=5e-2)), (out, ref)
    print("KERNEL_OK")
</pallas_src>

<mosaic_0001>
module attributes {stable_mosaic.version = 11 : i64} {
  func.func @xw_kernel(%arg0: i32, %arg1: memref<128x128xbf16, #tpu.memory_space<vmem>>, %arg2: memref<128x128xbf16, #tpu.memory_space<vmem>>, %arg3: memref<128x1xf32, #tpu.memory_space<vmem>>, %arg4: memref<128x128xbf16, #tpu.memory_space<vmem>>) attributes {dimension_semantics = [#tpu.dimension_semantics<parallel>], iteration_bounds = array<i64: 1>, scalar_prefetch = 0 : i64, scratch_operands = 0 : i64, tpu.core_type = #tpu.core_type<tc>, window_params = [{transform_indices = @transform_0, window_bounds = array<i64: 128, 128>}, {pipeline_mode = #tpu.pipeline_mode<synchronous>, transform_indices = @transform_1, window_bounds = array<i64: 128, 128>}, {transform_indices = @transform_2, window_bounds = array<i64: 128, 1>}, {transform_indices = @transform_3, window_bounds = array<i64: 128, 128>}]} {
    %c0 = arith.constant 0 : index
    %c0_0 = arith.constant 0 : index
    %0 = vector.load %arg1[%c0, %c0_0] : memref<128x128xbf16, #tpu.memory_space<vmem>>, vector<128x128xbf16>
    %c0_1 = arith.constant 0 : index
    %c0_2 = arith.constant 0 : index
    %1 = vector.load %arg2[%c0_1, %c0_2] : memref<128x128xbf16, #tpu.memory_space<vmem>>, vector<128x128xbf16>
    %cst = arith.constant dense<0.000000e+00> : vector<128x128xf32>
    %2 = tpu.matmul %0, %1, %cst {dimension_numbers = #tpu.dot_dimension_numbers<[1], [0], [0], [1], [0, 0, 1, 1], [], []>} : vector<128x128xbf16>, vector<128x128xbf16>, vector<128x128xf32> -> vector<128x128xf32>
    %c0_3 = arith.constant 0 : index
    %c0_4 = arith.constant 0 : index
    %3 = vector.load %arg3[%c0_3, %c0_4] : memref<128x1xf32, #tpu.memory_space<vmem>>, vector<128x1xf32>
    %4 = vector.broadcast %3 : vector<128x1xf32> to vector<128x128xf32>
    %5 = arith.mulf %2, %4 : vector<128x128xf32>
    %6 = arith.truncf %5 : vector<128x128xf32> to vector<128x128xbf16>
    %c0_5 = arith.constant 0 : index
    %c0_6 = arith.constant 0 : index
    %7 = vector.load %arg4[%c0_5, %c0_6] : memref<128x128xbf16, #tpu.memory_space<vmem>>, vector<128x128xbf16>
    tpu.vector_store %arg4[%c0_5, %c0_6], %6 {strides = array<i32>} : memref<128x128xbf16, #tpu.memory_space<vmem>>, vector<128x128xbf16>,
    return
  }
  func.func @transform_0(%arg0: i32) -> (i32, i32) {
    %c0_i32 = arith.constant 0 : i32
    %c0_i32_0 = arith.constant 0 : i32
    return %arg0, %c0_i32 : i32, i32
  }
  func.func @transform_1(%arg0: i32) -> (i32, i32) {
    %c0_i32 = arith.constant 0 : i32
    %c0_i32_0 = arith.constant 0 : i32
    %c0_i32_1 = arith.constant 0 : i32
    return %c0_i32, %c0_i32_0 : i32, i32
  }
  func.func @transform_2(%arg0: i32) -> (i32, i32) {
    %c0_i32 = arith.constant 0 : i32
    %c0_i32_0 = arith.constant 0 : i32
    return %arg0, %c0_i32 : i32, i32
  }
  func.func @transform_3(%arg0: i32) -> (i32, i32) {
    %c0_i32 = arith.constant 0 : i32
    %c0_i32_0 = arith.constant 0 : i32
    return %arg0, %c0_i32 : i32, i32
  }
}

</mosaic_0001>

<bundles_post_ra>
// kernel: tpu_custom_call.1
= control target key start
LH: loop header
LB: loop body
LE: loop exit
PB: predicated region body
PF: predicated region fallthrough
CT: control target
= control target key end

     0   :  { %v538_v2 = vmov 0   ;;  %s661_s0 = inlined_call_operand.vmem [shape: bf16[128,128], index: 0, kind: input, shape index: {}]   ;;  %s662_s1 = inlined_call_operand.vmem [shape: bf16[128,128], index: 1, kind: input, shape index: {}]   ;;  %s663_s2 = inlined_call_operand.vmem [shape: f32[128,1], index: 2, kind: input, shape index: {}]   ;;  %s664_s3 = inlined_call_operand.hbm [shape: bf16[128,128], index: 3, kind: output, shape index: {}]  }
   0x1   :  { %v192_v0 = vld [vmem:[%s663_s2] sm:$0xff]  ;;  %v433_v1 = vld [vmem:[%s662_s1 + $0x38] sm:$0xff]  ;;  %509 = vset.pattern.permute.xlu0 %v538_v2  ;;  %510 = vset.pattern.permute.xlu1 %v538_v2  ;;  %v194_v3 = vld [vmem:[%s663_s2 + $0x10] sm:$0xff] }
   0x2   :  { %210 = vperm.xlu0 %509, %v192_v0   ;;  %143 = vmatpush.bf16.msra.mxu0 %v433_v1  ;;  %v432_v4 = vld [vmem:[%s662_s1 + $0x30] sm:$0xff]  ;;  %v431_v5 = vld [vmem:[%s662_s1 + $0x28] sm:$0xff]  ;;  %v196_v6 = vld [vmem:[%s663_s2 + $0x20] sm:$0xff] }
   0x3   :  { %481 = vmatpush.bf16.msra.mxu1 %v433_v1  ;;  %482 = vmatpush.bf16.msra.mxu2 %v433_v1  ;;  %v193_v7 = vld [vmem:[%s663_s2 + $0x8] sm:$0xff] }
   0x4   :  { %483 = vmatpush.bf16.msra.mxu3 %v433_v1  ;;  %220 = vperm.xlu1 %510, %v194_v3  }
   0x5   :  { %511 = vset.pattern.permute.xlu2 %v538_v2 }
   0x6   :  { %144 = vmatpush.bf16.msra.mxu0 %v432_v4 }
   0x7   :  { %484 = vmatpush.bf16.msra.mxu1 %v432_v4  ;;  %485 = vmatpush.bf16.msra.mxu2 %v432_v4 }
   0x8   :  { %8 = vsyncpa [#allocation3], 0  ;;  %486 = vmatpush.bf16.msra.mxu3 %v432_v4  ;;  %230 = vperm.xlu2 %511, %v196_v6   ;;  %v195_v8 = vld [vmem:[%s663_s2 + $0x18] sm:$0xff]  ;;  %v430_v9 = vld [vmem:[%s662_s1 + $0x20] sm:$0xff]  ;;  %s342_s23 = sshll.u32 %s664_s3, 4  ;;  %s540_s24 = smov 64   ;;  %s343_s23 = int_to_ptr.hbm [resolvable:$true] %s342_s23 }
   0x9   :  { %v197_v10 = vld [vmem:[%s663_s2 + $0x28] sm:$0xff]  ;;  %v429_v11 = vld [vmem:[%s662_s1 + $0x18] sm:$0xff]  ;;  %v198_v12 = vld [vmem:[%s663_s2 + $0x30] sm:$0xff]  ;;  %s541_s25 = smov 4  }
   0xa   :  { %215 = vperm.xlu0 %509, %v193_v7   ;;  %145 = vmatpush.bf16.msra.mxu0 %v431_v5  ;;  %v199_v13 = vld [vmem:[%s663_s2 + $0x38] sm:$0xff]  ;;  %v428_v14 = vld [vmem:[%s662_s1 + $0x10] sm:$0xff]  ;;  %v200_v15 = vld [vmem:[%s663_s2 + $0x40] sm:$0xff] }
   0xb   :  { %487 = vmatpush.bf16.msra.mxu1 %v431_v5  ;;  %488 = vmatpush.bf16.msra.mxu2 %v431_v5  ;;  %v427_v16 = vld [vmem:[%s662_s1 + $0x8] sm:$0xff]  ;;  %v202_v18 = vld [vmem:[%s663_s2 + $0x50] sm:$0xff]  ;;  %v426_v19 = vld [vmem:[%s662_s1] sm:$0xff] }
   0xc   :  { %489 = vmatpush.bf16.msra.mxu3 %v431_v5  ;;  %225 = vperm.xlu1 %510, %v195_v8   ;;  %v201_v17 = vld [vmem:[%s663_s2 + $0x48] sm:$0xff]  ;;  %v418_v20 = vld [vmem:[%s661_s0] sm:$0xff]  ;;  %v203_v21 = vld [vmem:[%s663_s2 + $0x58] sm:$0xff] }
   0xd   :  { %v420_v22 = vld [vmem:[%s661_s0 + $0x10] sm:$0xff]  ;;  %v204_v23 = vld [vmem:[%s663_s2 + $0x60] sm:$0xff]  ;;  %v205_v26 = vld [vmem:[%s663_s2 + $0x68] sm:$0xff] }
   0xe   :  { %146 = vmatpush.bf16.msra.mxu0 %v430_v9  ;;  %v422_v24 = vld [vmem:[%s661_s0 + $0x20] sm:$0xff]  ;;  %v424_v25 = vld [vmem:[%s661_s0 + $0x30] sm:$0xff]  ;;  %v207_v28 = vld [vmem:[%s663_s2 + $0x78] sm:$0xff] }
   0xf   :  { %490 = vmatpush.bf16.msra.mxu1 %v430_v9  ;;  %491 = vmatpush.bf16.msra.mxu2 %v430_v9  ;;  %v206_v27 = vld [vmem:[%s663_s2 + $0x70] sm:$0xff]  ;;  %v419_v29 = vld [vmem:[%s661_s0 + $0x8] sm:$0xff]  ;;  %v421_v30 = vld [vmem:[%s661_s0 + $0x18] sm:$0xff] }
  0x10   :  { %492 = vmatpush.bf16.msra.mxu3 %v430_v9  ;;  %235 = vperm.xlu2 %511, %v197_v10   ;;  %v423_v31 = vld [vmem:[%s661_s0 + $0x28] sm:$0xff]  ;;  %v425_v32 = vld [vmem:[%s661_s0 + $0x38] sm:$0xff]  ;;  %s539_s0 = smov [#allocation2]  }
  0x11   :  { %s340_s2 = sshll.u32 %s539_s0, 4  ;;  %s341_s2 = int_to_ptr.vmem [resolvable:$true] %s340_s2 }
  0x12   :  { %240 = vperm.xlu0 %509, %v198_v12   ;;  %147 = vmatpush.bf16.msra.mxu0 %v429_v11 }
  0x13   :  { %493 = vmatpush.bf16.msra.mxu1 %v429_v11  ;;  %494 = vmatpush.bf16.msra.mxu2 %v429_v11 }
  0x14   :  { %495 = vmatpush.bf16.msra.mxu3 %v429_v11  ;;  %245 = vperm.xlu1 %510, %v199_v13  }
  0x16   :  { %148 = vmatpush.bf16.msra.mxu0 %v428_v14 }
  0x17   :  { %496 = vmatpush.bf16.msra.mxu1 %v428_v14  ;;  %497 = vmatpush.bf16.msra.mxu2 %v428_v14 }
  0x18   :  { %498 = vmatpush.bf16.msra.mxu3 %v428_v14  ;;  %250 = vperm.xlu2 %511, %v200_v15  }
  0x1a   :  { %255 = vperm.xlu0 %509, %v201_v17   ;;  %149 = vmatpush.bf16.msra.mxu0 %v427_v16 }
  0x1b   :  { %499 = vmatpush.bf16.msra.mxu1 %v427_v16  ;;  %500 = vmatpush.bf16.msra.mxu2 %v427_v16 }
  0x1c   :  { %501 = vmatpush.bf16.msra.mxu3 %v427_v16  ;;  %260 = vperm.xlu1 %510, %v202_v18  }
  0x1e   :  { %150 = vmatpush.bf16.msra.mxu0 %v426_v19 }
  0x1f   :  { %502 = vmatpush.bf16.msra.mxu1 %v426_v19  ;;  %503 = vmatpush.bf16.msra.mxu2 %v426_v19 }
  0x20   :  { %504 = vmatpush.bf16.msra.mxu3 %v426_v19  ;;  %265 = vperm.xlu2 %511, %v203_v21  }
  0x21   :  { %151 = vmatmul.bf16.vlgmr.msra.gmra.mxu0 %v418_v20 }
  0x22   :  { %270 = vperm.xlu0 %509, %v204_v23   ;;  %161 = vmatmul.bf16.vlgmr.msra.gmra.mxu1 %v420_v22 }
  0x23   :  { %171 = vmatmul.bf16.vlgmr.msra.gmra.mxu2 %v422_v24  ;;  %181 = vmatmul.bf16.vlgmr.msra.gmra.mxu3 %v424_v25 }
  0x24   :  { %275 = vperm.xlu1 %510, %v205_v26  }
  0x28   :  { %280 = vperm.xlu2 %511, %v206_v27  }
  0x2a   :  { %285 = vperm.xlu0 %509, %v207_v28  }
  0x31   :  { %156 = vmatmul.bf16.gmra.mxu0 %v419_v29 }
  0x32   :  { %166 = vmatmul.bf16.gmra.mxu1 %v421_v30 }
  0x33   :  { %176 = vmatmul.bf16.gmra.mxu2 %v423_v31  ;;  %186 = vmatmul.bf16.gmra.mxu3 %v425_v32 }
  0x62   :  { %v231_v37 = vpop.permute.xlu2 %230 }
  0x6a   :  { %v236_v41 = vpop.permute.xlu2 %235 }
  0x72   :  { %v251_v53 = vpop.permute.xlu2 %250 }
  0x74   :  { %v211_v33 = vpop.permute.xlu0 %210 }
  0x76   :  { %v221_v34 = vpop.permute.xlu1 %220 }
  0x7a   :  { %v266_v4 = vpop.permute.xlu2 %265 }
  0x7c   :  { %v216_v35 = vpop.permute.xlu0 %215 }
  0x7e   :  { %v226_v36 = vpop.permute.xlu1 %225 }
  0x82   :  { %v281_v16 = vpop.permute.xlu2 %280 }
  0x84   :  { %v241_v38 = vpop.permute.xlu0 %240 }
  0x86   :  { %v246_v39 = vpop.permute.xlu1 %245 }
  0x8c   :  { %v256_v43 = vpop.permute.xlu0 %255 }
  0x8e   :  { %v261_v44 = vpop.permute.xlu1 %260 }
  0x94   :  { %v271_v56 = vpop.permute.xlu0 %270 }
  0x96   :  { %v276_v57 = vpop.permute.xlu1 %275 }
  0x9c   :  { %v286_v15 = vpop.permute.xlu0 %285 }
  0x9e   :  { %v152_v40 = vpop.f32.mrf.mxu0 }
  0x9f   :  { %v162_v42 = vpop.f32.mrf.mxu1  ;;  %v288_v49 = vmul.f32 %v211_v33, %v152_v40 }
  0xa0   :  { %v292_v50 = vmul.f32 %v231_v37, %v162_v42 }
  0xa6   :  { %v172_v45 = vpop.f32.mrf.mxu2  ;;  %v182_v46 = vpop.f32.mrf.mxu3 }
  0xa7   :  { %v154_v47 = vpop.f32.mrf.mxu0  ;;  %v164_v48 = vpop.f32.mrf.mxu1  ;;  %v296_v60 = vmul.f32 %v251_v53, %v172_v45  ;;  %v300_v61 = vmul.f32 %v271_v56, %v182_v46 }
  0xa8   :  { %v289_v51 = vmul.f32 %v216_v35, %v154_v47  ;;  %v293_v52 = vmul.f32 %v236_v41, %v164_v48 }
  0xaa   :  { %v437_v54 = vpack.c.bf16 %v289_v51, %v288_v49  ;;  %v447_v55 = vpack.c.bf16 %v293_v52, %v292_v50 }
  0xac   :  { %438 = vst [vmem:[#allocation2] sm:$0xff] %v437_v54  }
  0xad   :  { %475 = vst [vmem:[#allocation2 + $0x10] sm:$0xff] %v447_v55  }
  0xae   :  { %v174_v58 = vpop.f32.mrf.mxu2  ;;  %v184_v59 = vpop.f32.mrf.mxu3 }
  0xaf   :  { %v297_v62 = vmul.f32 %v256_v43, %v174_v58  ;;  %v301_v63 = vmul.f32 %v276_v57, %v184_v59  ;;  %v157_v0 = vpop.f32.mrf.mxu0  ;;  %v167_v1 = vpop.f32.mrf.mxu1 }
  0xb0   :  { %v290_v9 = vmul.f32 %v221_v34, %v157_v0  ;;  %v294_v10 = vmul.f32 %v241_v38, %v167_v1 }
  0xb1   :  { %v457_v2 = vpack.c.bf16 %v297_v62, %v296_v60  ;;  %v467_v3 = vpack.c.bf16 %v301_v63, %v300_v61 }
  0xb3   :  { %477 = vst [vmem:[#allocation2 + $0x20] sm:$0xff] %v457_v2  }
  0xb4   :  { %479 = vst [vmem:[#allocation2 + $0x30] sm:$0xff] %v467_v3  }
  0xb6   :  { %v177_v5 = vpop.f32.mrf.mxu2  ;;  %v187_v6 = vpop.f32.mrf.mxu3 }
  0xb7   :  { %v159_v7 = vpop.f32.mrf.mxu0  ;;  %v169_v8 = vpop.f32.mrf.mxu1  ;;  %v298_v19 = vmul.f32 %v261_v44, %v177_v5  ;;  %v302_v20 = vmul.f32 %v281_v16, %v187_v6 }
  0xb8   :  { %v291_v11 = vmul.f32 %v226_v36, %v159_v7  ;;  %v295_v12 = vmul.f32 %v246_v39, %v169_v8 }
  0xba   :  { %v442_v13 = vpack.c.bf16 %v291_v11, %v290_v9  ;;  %v452_v14 = vpack.c.bf16 %v295_v12, %v294_v10 }
  0xbc   :  { %474 = vst [vmem:[#allocation2 + $0x8] sm:$0xff] %v442_v13  }
  0xbd   :  { %476 = vst [vmem:[#allocation2 + $0x18] sm:$0xff] %v452_v14  }
  0xbe   :  { %v179_v17 = vpop.f32.mrf.mxu2  ;;  %v189_v18 = vpop.f32.mrf.mxu3 }
  0xbf   :  { %v299_v21 = vmul.f32 %v266_v4, %v179_v17  ;;  %v303_v22 = vmul.f32 %v286_v15, %v189_v18 }
  0xc1   :  { %v462_v23 = vpack.c.bf16 %v299_v21, %v298_v19  ;;  %v472_v24 = vpack.c.bf16 %v303_v22, %v302_v20 }
  0xc3   :  { %478 = vst [vmem:[#allocation2 + $0x28] sm:$0xff] %v462_v23  }
  0xc4   :  { %480 = vst [vmem:[#allocation2 + $0x38] sm:$0xff] %v472_v24  }
  0xc5   :  { %348 = dma.vmem_to_hbm [thread:$0]  %s341_s2, 1024, %s343_s23, [#allocation3], %s540_s24, %s540_s24, %s541_s25  }
  0xc6   :  { %536 = dma.done.wait [#allocation3], 1024  }
  0xc7   :  { %537 = vsyncadd [#allocation3], 4294966272 }
  0xc8   :  { %353 = vsyncpa [#allocation3], 1 }

</bundles_post_ra>
